<compile_context>
chip_gen: v5e
topology: v5e:2x2
jax: 0.10.0
libtpu: 0.0.40
codegen_flags: <defaults>
</compile_context>

<pallas_src>
import functools

import jax
import jax.numpy as jnp
from jax.experimental import pallas as pl
from jax.experimental.pallas import tpu as pltpu

# Logical (unpadded) sizes from the module.
F_IN, H1, H2, F_OUT = 3, 4, 2, 1

SUB = 8             # sublane granularity (batch rows per vreg row-group)
HPAD = 8            # hidden dims padded only to 8 lanes (H1=4, H2=2 both fit)
SPLIT_ROWS = 2048   # batches >= this get >= 2 grid steps (v7x dual-TC sharding)


def _round_up(n, m):
    return ((n + m - 1) // m) * m


def _pad2(x, rows, cols):
    r, c = x.shape
    return jnp.pad(x, ((0, rows - r), (0, cols - c)))


def mlp_kernel(x_ref, w1_ref, b1_ref, w2_ref, b2_ref, w3_ref, b3_ref, o_ref):
    """One batch tile: x (tb, 3) -> out (tb, 1). Pure VPU broadcast-FMAs."""
    f32 = jnp.float32
    x = x_ref[...].astype(f32)               # (tb, 3)
    w1 = w1_ref[...].astype(f32)             # (3, 8)
    w2 = w2_ref[...].astype(f32)             # (8, 8) -- rows >= H1 are zero pad
    w3 = w3_ref[...].astype(f32)             # (8, 8) -- only column 0 is real

    # fc1 + relu : 3 broadcast-FMAs
    h = b1_ref[...]                           # (1, 8) f32, broadcasts up
    for k in range(F_IN):
        h = h + x[:, k:k + 1] * w1[k:k + 1, :]
    h = jnp.maximum(h, 0.0)

    # TODO(synk): nn.Dropout(0.1) is identity in eval mode; training-mode masking
    # would use pltpu.prng_seed + pltpu.stateful_bernoulli if ever needed.

    # fc2 + relu : only the H1=4 live lanes of h contribute
    g = b2_ref[...]
    for k in range(H1):
        g = g + h[:, k:k + 1] * w2[k:k + 1, :]
    g = jnp.maximum(g, 0.0)

    # fc3 : only the H2=2 live lanes of g contribute; lane 0 is the real output
    z = b3_ref[...]
    for k in range(H2):
        z = z + g[:, k:k + 1] * w3[k:k + 1, :]

    zc = z[:, :F_OUT]                         # (tb, 1)
    o_ref[...] = (1.0 / (1.0 + jnp.exp(-zc))).astype(o_ref.dtype)   # sigmoid


def prepare_params(params, compute_dtype=jnp.bfloat16):
    """One-time prep: transpose + pad weights into 8-lane layouts. Cache & reuse."""
    w1, b1, w2, b2, w3, b3 = params
    w1_p = _pad2(w1.T.astype(compute_dtype), F_IN, HPAD)    # (3, 8): K stays 3
    w2_p = _pad2(w2.T.astype(compute_dtype), HPAD, HPAD)    # (8, 8)
    w3_p = _pad2(w3.T.astype(compute_dtype), HPAD, HPAD)    # (8, 8)
    b1_p = jnp.pad(b1.astype(jnp.float32), (0, HPAD - H1))[None, :]      # (1, 8)
    b2_p = jnp.pad(b2.astype(jnp.float32), (0, HPAD - H2))[None, :]      # (1, 8)
    b3_p = jnp.pad(b3.astype(jnp.float32), (0, HPAD - F_OUT))[None, :]   # (1, 8)
    return (w1_p, b1_p, w2_p, b2_p, w3_p, b3_p)


def _choose_tile(batch, block_rows):
    """Batch-tile size: a multiple of 8 (or == batch), capped at block_rows."""
    tb = min(block_rows, batch)
    if tb == batch:
        if batch >= SPLIT_ROWS:
            # >= 2 grid steps so ("parallel",) can shard over v7x's 2 TensorCores.
            return _round_up(-(-batch // 2), SUB)
        return batch                        # single full-extent block (any size legal)
    return max(SUB, (tb // SUB) * SUB)      # interior tiles must be a multiple of 8


@functools.partial(jax.jit, static_argnames=("block_rows",))
def net_forward(x, prepped, *, block_rows=4096):
    """Forward pass matching Net.forward (eval mode). x: (B, 3) or (3,)."""
    if x.ndim == 1:
        x = x[None, :]
    x = x.astype(jnp.float32)
    B = x.shape[0]

    tb = _choose_tile(B, block_rows)
    grid = (pl.cdiv(B, tb),)                # ragged last tile handled by Pallas masking

    w1_p, b1_p, w2_p, b2_p, w3_p, b3_p = prepped

    row_spec = lambda cols: pl.BlockSpec((tb, cols), lambda i: (i, 0))   # batch-tiled
    fix_spec = lambda shape: pl.BlockSpec(shape, lambda i: (0, 0))       # VMEM-resident

    return pl.pallas_call(
        mlp_kernel,
        out_shape=jax.ShapeDtypeStruct((B, F_OUT), jnp.float32),
        grid=grid,
        in_specs=[
            row_spec(F_IN),
            fix_spec((F_IN, HPAD)), fix_spec((1, HPAD)),
            fix_spec((HPAD, HPAD)), fix_spec((1, HPAD)),
            fix_spec((HPAD, HPAD)), fix_spec((1, HPAD)),
        ],
        out_specs=row_spec(F_OUT),
        compiler_params=pltpu.CompilerParams(
            dimension_semantics=("parallel",),          # v7x: shard tiles over 2 TCs
            vmem_limit_bytes=48 * 1024 * 1024),
    )(x, w1_p, b1_p, w2_p, b2_p, w3_p, b3_p)


def init_params(key):
    """Deterministic init mirroring the module: xavier_uniform_ weights, default biases."""
    ks = jax.random.split(key, 6)

    def xavier(k, out_f, in_f):
        limit = jnp.sqrt(6.0 / (in_f + out_f))
        return jax.random.uniform(k, (out_f, in_f), jnp.float32, -limit, limit)

    def default_bias(k, out_f, in_f):
        bound = 1.0 / jnp.sqrt(jnp.float32(in_f))
        return jax.random.uniform(k, (out_f,), jnp.float32, -bound, bound)

    w1 = xavier(ks[0], H1, F_IN); b1 = default_bias(ks[1], H1, F_IN)
    w2 = xavier(ks[2], H2, H1);   b2 = default_bias(ks[3], H2, H1)
    w3 = xavier(ks[4], F_OUT, H2); b3 = default_bias(ks[5], F_OUT, H2)
    return (w1, b1, w2, b2, w3, b3)


def _reference(x, params):
    w1, b1, w2, b2, w3, b3 = params
    hi = jax.lax.Precision.HIGHEST
    h = jnp.maximum(jnp.dot(x, w1.T, precision=hi) + b1, 0.0)
    h = jnp.maximum(jnp.dot(h, w2.T, precision=hi) + b2, 0.0)
    return jax.nn.sigmoid(jnp.dot(h, w3.T, precision=hi) + b3)


def _quantize_weights(params):
    w1, b1, w2, b2, w3, b3 = params
    q = lambda w: w.astype(jnp.bfloat16).astype(jnp.float32)
    return (q(w1), b1, q(w2), b2, q(w3), b3)


if __name__ == "__main__":
    key = jax.random.PRNGKey(0)
    pkey, k1, k2, k3 = jax.random.split(key, 4)
    params = init_params(pkey)

    # One-time (cached) parameter prep — not re-run per forward call.
    prepped_f32 = prepare_params(params, compute_dtype=jnp.float32)
    prepped_bf16 = prepare_params(params)                 # bf16 weights (default)

    # 1) Small batch, single tile, f32 weights (numerically faithful path).
    x8 = jax.random.normal(k1, (8, F_IN), jnp.float32)
    out8 = jax.block_until_ready(net_forward(x8, prepped_f32))
    assert out8.shape == (8, F_OUT)
    assert jnp.allclose(out8, _reference(x8, params), atol=1e-5)

    # 2) Multi-tile grid with a ragged last tile (40 = 16 + 16 + 8), f32 weights.
    x40 = jax.random.normal(k2, (40, F_IN), jnp.float32)
    out40 = jax.block_until_ready(net_forward(x40, prepped_f32, block_rows=16))
    assert out40.shape == (40, F_OUT)
    assert jnp.allclose(out40, _reference(x40, params), atol=1e-5)

    # 3) Default bf16 weights + default tiling; batch >= SPLIT_ROWS exercises the
    #    >= 2-grid-step split used for v7x dual-TC sharding.
    x2560 = jax.random.normal(k3, (2560, F_IN), jnp.float32)
    out2560 = jax.block_until_ready(net_forward(x2560, prepped_bf16))
    assert out2560.shape == (2560, F_OUT)
    assert jnp.allclose(out2560, _reference(x2560, _quantize_weights(params)), atol=1e-5)
    assert jnp.allclose(out2560, _reference(x2560, params), atol=5e-2)

    # 4) 1-D input path (matches the module's unsqueeze).
    x1 = jnp.array([0.3, -1.2, 0.7], jnp.float32)
    out1 = jax.block_until_ready(net_forward(x1, prepped_f32))
    assert out1.shape == (1, F_OUT)
    assert jnp.allclose(out1, _reference(x1[None, :], params), atol=1e-5)

    print("KERNEL_OK")
</pallas_src>

<mosaic_0001>
module attributes {stable_mosaic.version = 11 : i64} {
  func.func @mlp_kernel(%arg0: i32, %arg1: memref<8x3xf32, #tpu.memory_space<vmem>>, %arg2: memref<3x8xf32, #tpu.memory_space<vmem>>, %arg3: memref<1x8xf32, #tpu.memory_space<vmem>>, %arg4: memref<8x8xf32, #tpu.memory_space<vmem>>, %arg5: memref<1x8xf32, #tpu.memory_space<vmem>>, %arg6: memref<8x8xf32, #tpu.memory_space<vmem>>, %arg7: memref<1x8xf32, #tpu.memory_space<vmem>>, %arg8: memref<8x1xf32, #tpu.memory_space<vmem>>) attributes {dimension_semantics = [#tpu.dimension_semantics<parallel>], iteration_bounds = array<i64: 1>, scalar_prefetch = 0 : i64, scratch_operands = 0 : i64, tpu.core_type = #tpu.core_type<tc>, window_params = [{transform_indices = @transform_0, window_bounds = array<i64: 8, 3>}, {pipeline_mode = #tpu.pipeline_mode<synchronous>, transform_indices = @transform_1, window_bounds = array<i64: 3, 8>}, {pipeline_mode = #tpu.pipeline_mode<synchronous>, transform_indices = @transform_2, window_bounds = array<i64: 1, 8>}, {pipeline_mode = #tpu.pipeline_mode<synchronous>, transform_indices = @transform_3, window_bounds = array<i64: 8, 8>}, {pipeline_mode = #tpu.pipeline_mode<synchronous>, transform_indices = @transform_4, window_bounds = array<i64: 1, 8>}, {pipeline_mode = #tpu.pipeline_mode<synchronous>, transform_indices = @transform_5, window_bounds = array<i64: 8, 8>}, {pipeline_mode = #tpu.pipeline_mode<synchronous>, transform_indices = @transform_6, window_bounds = array<i64: 1, 8>}, {transform_indices = @transform_7, window_bounds = array<i64: 8, 1>}]} {
    %c0 = arith.constant 0 : index
    %c0_0 = arith.constant 0 : index
    %0 = vector.load %arg1[%c0, %c0_0] : memref<8x3xf32, #tpu.memory_space<vmem>>, vector<8x3xf32>
    %c0_1 = arith.constant 0 : index
    %c0_2 = arith.constant 0 : index
    %1 = vector.load %arg2[%c0_1, %c0_2] : memref<3x8xf32, #tpu.memory_space<vmem>>, vector<3x8xf32>
    %c0_3 = arith.constant 0 : index
    %c0_4 = arith.constant 0 : index
    %2 = vector.load %arg4[%c0_3, %c0_4] : memref<8x8xf32, #tpu.memory_space<vmem>>, vector<8x8xf32>
    %c0_5 = arith.constant 0 : index
    %c0_6 = arith.constant 0 : index
    %3 = vector.load %arg6[%c0_5, %c0_6] : memref<8x8xf32, #tpu.memory_space<vmem>>, vector<8x8xf32>
    %c0_7 = arith.constant 0 : index
    %c0_8 = arith.constant 0 : index
    %4 = vector.load %arg3[%c0_7, %c0_8] : memref<1x8xf32, #tpu.memory_space<vmem>>, vector<1x8xf32>
    %5 = vector.extract_strided_slice %0 {offsets = [0, 0], sizes = [8, 1], strides = [1, 1]} : vector<8x3xf32> to vector<8x1xf32>
    %6 = vector.extract_strided_slice %1 {offsets = [0, 0], sizes = [1, 8], strides = [1, 1]} : vector<3x8xf32> to vector<1x8xf32>
    %7 = vector.broadcast %5 : vector<8x1xf32> to vector<8x8xf32>
    %8 = vector.broadcast %6 : vector<1x8xf32> to vector<8x8xf32>
    %9 = arith.mulf %7, %8 : vector<8x8xf32>
    %10 = vector.broadcast %4 : vector<1x8xf32> to vector<8x8xf32>
    %11 = arith.addf %10, %9 : vector<8x8xf32>
    %12 = vector.extract_strided_slice %0 {offsets = [0, 1], sizes = [8, 1], strides = [1, 1]} : vector<8x3xf32> to vector<8x1xf32>
    %13 = vector.extract_strided_slice %1 {offsets = [1, 0], sizes = [1, 8], strides = [1, 1]} : vector<3x8xf32> to vector<1x8xf32>
    %14 = vector.broadcast %12 : vector<8x1xf32> to vector<8x8xf32>
    %15 = vector.broadcast %13 : vector<1x8xf32> to vector<8x8xf32>
    %16 = arith.mulf %14, %15 : vector<8x8xf32>
    %17 = arith.addf %11, %16 : vector<8x8xf32>
    %18 = vector.extract_strided_slice %0 {offsets = [0, 2], sizes = [8, 1], strides = [1, 1]} : vector<8x3xf32> to vector<8x1xf32>
    %19 = vector.extract_strided_slice %1 {offsets = [2, 0], sizes = [1, 8], strides = [1, 1]} : vector<3x8xf32> to vector<1x8xf32>
    %20 = vector.broadcast %18 : vector<8x1xf32> to vector<8x8xf32>
    %21 = vector.broadcast %19 : vector<1x8xf32> to vector<8x8xf32>
    %22 = arith.mulf %20, %21 : vector<8x8xf32>
    %23 = arith.addf %17, %22 : vector<8x8xf32>
    %cst = arith.constant 0.000000e+00 : f32
    %24 = vector.broadcast %cst : f32 to vector<8x8xf32>
    %25 = arith.maximumf %23, %24 : vector<8x8xf32>
    %c0_9 = arith.constant 0 : index
    %c0_10 = arith.constant 0 : index
    %26 = vector.load %arg5[%c0_9, %c0_10] : memref<1x8xf32, #tpu.memory_space<vmem>>, vector<1x8xf32>
    %27 = vector.extract_strided_slice %25 {offsets = [0, 0], sizes = [8, 1], strides = [1, 1]} : vector<8x8xf32> to vector<8x1xf32>
    %28 = vector.extract_strided_slice %2 {offsets = [0, 0], sizes = [1, 8], strides = [1, 1]} : vector<8x8xf32> to vector<1x8xf32>
    %29 = vector.broadcast %27 : vector<8x1xf32> to vector<8x8xf32>
    %30 = vector.broadcast %28 : vector<1x8xf32> to vector<8x8xf32>
    %31 = arith.mulf %29, %30 : vector<8x8xf32>
    %32 = vector.broadcast %26 : vector<1x8xf32> to vector<8x8xf32>
    %33 = arith.addf %32, %31 : vector<8x8xf32>
    %34 = vector.extract_strided_slice %25 {offsets = [0, 1], sizes = [8, 1], strides = [1, 1]} : vector<8x8xf32> to vector<8x1xf32>
    %35 = vector.extract_strided_slice %2 {offsets = [1, 0], sizes = [1, 8], strides = [1, 1]} : vector<8x8xf32> to vector<1x8xf32>
    %36 = vector.broadcast %34 : vector<8x1xf32> to vector<8x8xf32>
    %37 = vector.broadcast %35 : vector<1x8xf32> to vector<8x8xf32>
    %38 = arith.mulf %36, %37 : vector<8x8xf32>
    %39 = arith.addf %33, %38 : vector<8x8xf32>
    %40 = vector.extract_strided_slice %25 {offsets = [0, 2], sizes = [8, 1], strides = [1, 1]} : vector<8x8xf32> to vector<8x1xf32>
    %41 = vector.extract_strided_slice %2 {offsets = [2, 0], sizes = [1, 8], strides = [1, 1]} : vector<8x8xf32> to vector<1x8xf32>
    %42 = vector.broadcast %40 : vector<8x1xf32> to vector<8x8xf32>
    %43 = vector.broadcast %41 : vector<1x8xf32> to vector<8x8xf32>
    %44 = arith.mulf %42, %43 : vector<8x8xf32>
    %45 = arith.addf %39, %44 : vector<8x8xf32>
    %46 = vector.extract_strided_slice %25 {offsets = [0, 3], sizes = [8, 1], strides = [1, 1]} : vector<8x8xf32> to vector<8x1xf32>
    %47 = vector.extract_strided_slice %2 {offsets = [3, 0], sizes = [1, 8], strides = [1, 1]} : vector<8x8xf32> to vector<1x8xf32>
    %48 = vector.broadcast %46 : vector<8x1xf32> to vector<8x8xf32>
    %49 = vector.broadcast %47 : vector<1x8xf32> to vector<8x8xf32>
    %50 = arith.mulf %48, %49 : vector<8x8xf32>
    %51 = arith.addf %45, %50 : vector<8x8xf32>
    %cst_11 = arith.constant 0.000000e+00 : f32
    %52 = vector.broadcast %cst_11 : f32 to vector<8x8xf32>
    %53 = arith.maximumf %51, %52 : vector<8x8xf32>
    %c0_12 = arith.constant 0 : index
    %c0_13 = arith.constant 0 : index
    %54 = vector.load %arg7[%c0_12, %c0_13] : memref<1x8xf32, #tpu.memory_space<vmem>>, vector<1x8xf32>
    %55 = vector.extract_strided_slice %53 {offsets = [0, 0], sizes = [8, 1], strides = [1, 1]} : vector<8x8xf32> to vector<8x1xf32>
    %56 = vector.extract_strided_slice %3 {offsets = [0, 0], sizes = [1, 8], strides = [1, 1]} : vector<8x8xf32> to vector<1x8xf32>
    %57 = vector.broadcast %55 : vector<8x1xf32> to vector<8x8xf32>
    %58 = vector.broadcast %56 : vector<1x8xf32> to vector<8x8xf32>
    %59 = arith.mulf %57, %58 : vector<8x8xf32>
    %60 = vector.broadcast %54 : vector<1x8xf32> to vector<8x8xf32>
    %61 = arith.addf %60, %59 : vector<8x8xf32>
    %62 = vector.extract_strided_slice %53 {offsets = [0, 1], sizes = [8, 1], strides = [1, 1]} : vector<8x8xf32> to vector<8x1xf32>
    %63 = vector.extract_strided_slice %3 {offsets = [1, 0], sizes = [1, 8], strides = [1, 1]} : vector<8x8xf32> to vector<1x8xf32>
    %64 = vector.broadcast %62 : vector<8x1xf32> to vector<8x8xf32>
    %65 = vector.broadcast %63 : vector<1x8xf32> to vector<8x8xf32>
    %66 = arith.mulf %64, %65 : vector<8x8xf32>
    %67 = arith.addf %61, %66 : vector<8x8xf32>
    %68 = vector.extract_strided_slice %67 {offsets = [0, 0], sizes = [8, 1], strides = [1, 1]} : vector<8x8xf32> to vector<8x1xf32>
    %cst_14 = arith.constant 0.000000e+00 : f32
    %69 = vector.broadcast %cst_14 : f32 to vector<8x1xf32>
    %70 = arith.subf %69, %68 : vector<8x1xf32>
    %71 = math.exp %70 : vector<8x1xf32>
    %cst_15 = arith.constant 1.000000e+00 : f32
    %72 = vector.broadcast %cst_15 : f32 to vector<8x1xf32>
    %73 = arith.addf %72, %71 : vector<8x1xf32>
    %cst_16 = arith.constant 1.000000e+00 : f32
    %74 = vector.broadcast %cst_16 : f32 to vector<8x1xf32>
    %75 = arith.divf %74, %73 : vector<8x1xf32>
    %c0_17 = arith.constant 0 : index
    %c0_18 = arith.constant 0 : index
    %76 = vector.load %arg8[%c0_17, %c0_18] : memref<8x1xf32, #tpu.memory_space<vmem>>, vector<8x1xf32>
    tpu.vector_store %arg8[%c0_17, %c0_18], %75 {strides = array<i32>} : memref<8x1xf32, #tpu.memory_space<vmem>>, vector<8x1xf32>,
    return
  }
  func.func @transform_0(%arg0: i32) -> (i32, i32) {
    %c0_i32 = arith.constant 0 : i32
    %c0_i32_0 = arith.constant 0 : i32
    return %arg0, %c0_i32 : i32, i32
  }
  func.func @transform_1(%arg0: i32) -> (i32, i32) {
    %c0_i32 = arith.constant 0 : i32
    %c0_i32_0 = arith.constant 0 : i32
    %c0_i32_1 = arith.constant 0 : i32
    return %c0_i32, %c0_i32_0 : i32, i32
  }
  func.func @transform_2(%arg0: i32) -> (i32, i32) {
    %c0_i32 = arith.constant 0 : i32
    %c0_i32_0 = arith.constant 0 : i32
    %c0_i32_1 = arith.constant 0 : i32
    return %c0_i32, %c0_i32_0 : i32, i32
  }
  func.func @transform_3(%arg0: i32) -> (i32, i32) {
    %c0_i32 = arith.constant 0 : i32
    %c0_i32_0 = arith.constant 0 : i32
    %c0_i32_1 = arith.constant 0 : i32
    return %c0_i32, %c0_i32_0 : i32, i32
  }
  func.func @transform_4(%arg0: i32) -> (i32, i32) {
    %c0_i32 = arith.constant 0 : i32
    %c0_i32_0 = arith.constant 0 : i32
    %c0_i32_1 = arith.constant 0 : i32
    return %c0_i32, %c0_i32_0 : i32, i32
  }
  func.func @transform_5(%arg0: i32) -> (i32, i32) {
    %c0_i32 = arith.constant 0 : i32
    %c0_i32_0 = arith.constant 0 : i32
    %c0_i32_1 = arith.constant 0 : i32
    return %c0_i32, %c0_i32_0 : i32, i32
  }
  func.func @transform_6(%arg0: i32) -> (i32, i32) {
    %c0_i32 = arith.constant 0 : i32
    %c0_i32_0 = arith.constant 0 : i32
    %c0_i32_1 = arith.constant 0 : i32
    return %c0_i32, %c0_i32_0 : i32, i32
  }
  func.func @transform_7(%arg0: i32) -> (i32, i32) {
    %c0_i32 = arith.constant 0 : i32
    %c0_i32_0 = arith.constant 0 : i32
    return %arg0, %c0_i32 : i32, i32
  }
}

</mosaic_0001>

<bundles_post_ra>
// kernel: net_forward.1
= control target key start
LH: loop header
LB: loop body
LE: loop exit
PB: predicated region body
PF: predicated region fallthrough
CT: control target
= control target key end

     0   :  { %12 = vsyncpa [#allocation3], 0  ;;  %s347_s0 = inlined_call_operand.vmem [shape: f32[8,3], index: 0, kind: input, shape index: {}]   ;;  %s348_s1 = inlined_call_operand.hbm [shape: f32[3,8], index: 1, kind: input, shape index: {}]   ;;  %s349_s2 = inlined_call_operand.hbm [shape: f32[1,8], index: 2, kind: input, shape index: {}]   ;;  %s350_s3 = inlined_call_operand.vmem [shape: f32[8,8], index: 3, kind: input, shape index: {}]   ;;  %s351_s4 = inlined_call_operand.hbm [shape: f32[1,8], index: 4, kind: input, shape index: {}]   ;;  %s352_s5 = inlined_call_operand.vmem [shape: f32[8,8], index: 5, kind: input, shape index: {}]   ;;  %s353_s6 = inlined_call_operand.vmem [shape: f32[1,8], index: 6, kind: input, shape index: {}]   ;;  %s354_s7 = inlined_call_operand.vmem [shape: f32[8,1], index: 7, kind: output, shape index: {}]  }
   0x1   :  { %13 = vsyncpa [#allocation5], 0  ;;  %s32_s26 = sshll.u32 %s349_s2, 4  ;;  %s276_s27 = smov [#allocation4]   ;;  %s33_s26 = int_to_ptr.hbm [resolvable:$true] %s32_s26 }
   0x2   :  { %s34_s28 = sshll.u32 %s276_s27, 4  ;;  %s21_s8 = sshll.u32 %s348_s1, 4  ;;  %s35_s28 = int_to_ptr.vmem [resolvable:$true] %s34_s28  ;;  %s22_s8 = int_to_ptr.hbm [resolvable:$true] %s21_s8 }
   0x3   :  { %37 = dma.hbm_to_vmem [thread:$0]  %s33_s26, 16, %s35_s28, [#allocation5]  }
   0x4   :  { %s277_s9 = smov [#allocation2]   ;;  %s45_s13 = sshll.u32 %s351_s4, 4  ;;  %s46_s13 = int_to_ptr.hbm [resolvable:$true] %s45_s13 }
   0x5   :  { %s23_s10 = sshll.u32 %s277_s9, 4  ;;  %s278_s2 = smov [#allocation6]   ;;  %s24_s10 = int_to_ptr.vmem [resolvable:$true] %s23_s10 }
   0x6   :  { %26 = dma.hbm_to_vmem [thread:$0]  %s22_s8, 64, %s24_s10, [#allocation3]  }
   0x7   :  { %s47_s14 = sshll.u32 %s278_s2, 4  ;;  %s48_s14 = int_to_ptr.vmem [resolvable:$true] %s47_s14 }
   0x8   :  { %50 = dma.hbm_to_vmem [thread:$0]  %s46_s13, 16, %s48_s14, [#allocation5]  }
   0x9   :  { %272 = dma.done.wait [#allocation3], 64  }
   0xa   :  { %273 = vsyncadd [#allocation3], 4294967232 }
   0xb   :  { %274 = dma.done.wait [#allocation5], 32  }
   0xc   :  { %275 = vsyncadd [#allocation5], 4294967264  ;;  %v279_v0 = vmov 0   ;;  %v280_v1 = vmov 2   ;;  %v281_v2 = vmov 1   ;;  %v67_v3 = vld [vmem:[%s347_s0] sm:$0xff] }
   0xd   :  { %185 = vset.pattern.permute.xlu0 %v279_v0  ;;  %187 = vset.pattern.permute.xlu1 %v280_v1  ;;  %v68_v4 = vld [vmem:[#allocation2] sm:$0x7]  ;;  %v193_v7 = vld [vmem:[#allocation4] ss:$0 sm:$0xff]  ;;  %v282_v19 = vmov 3   ;;  %vm170_vm2 = vcmask 7168  }
   0xe   :  { %189 = vset.pattern.permute.xlu2 %v281_v2  ;;  %74 = vperm.xlu0 %185, %v67_v3   ;;  %v77_v6 = vperm.slane %v68_v4, 0  ;;  %v87_v9 = vperm.slane %v68_v4, 1  ;;  %v94_v10 = vperm.slane %v68_v4, 2  ;;  %v69_v21 = vld [vmem:[%s350_s3] sm:$0xff] }
   0xf   :  { %91 = vperm.xlu1 %187, %v67_v3   ;;  %v104_v22 = vperm.slane %v69_v21, 0  ;;  %v194_v23 = vld [vmem:[#allocation6] ss:$0 sm:$0xff]  ;;  %v114_v24 = vperm.slane %v69_v21, 1  ;;  %v121_v29 = vperm.slane %v69_v21, 2  ;;  %v128_v32 = vperm.slane %v69_v21, 3 }
  0x10   :  { %v70_v39 = vld [vmem:[%s352_s5] sm:$0xff] }
  0x11   :  { %v138_v40 = vperm.slane %v70_v39, 0  ;;  %v195_v42 = vld [vmem:[%s353_s6] ss:$0 sm:$0xff]  ;;  %v148_v44 = vperm.slane %v70_v39, 1 }
  0x16   :  { %186 = vset.pattern.permute.xlu0 %v281_v2 }
  0x17   :  { %188 = vset.pattern.permute.xlu1 %v279_v0  ;;  %84 = vperm.xlu0 %186, %v67_v3  }
  0x80   :  { %v75_v5 = vpop.permute.xlu0 %74 }
  0x81   :  { %v78_v8 = vmul.f32 %v77_v6, %v75_v5  ;;  %v92_v11 = vpop.permute.xlu1 %91 }
  0x82   :  { %v95_v15 = vmul.f32 %v94_v10, %v92_v11 }
  0x83   :  { %v82_v13 = vadd.f32 %v193_v7, %v78_v8 }
  0x89   :  { %v85_v12 = vpop.permute.xlu0 %84 }
  0x8a   :  { %v88_v14 = vmul.f32 %v87_v9, %v85_v12 }
  0x8c   :  { %v89_v16 = vadd.f32 %v88_v14, %v82_v13 }
  0x8e   :  { %v96_v17 = vadd.f32 %v95_v15, %v89_v16 }
  0x90   :  { %v97_v18 = vmax.f32 %v96_v17, 0.0 }
  0x92   :  { %111 = vperm.xlu2 %189, %v97_v18   ;;  %101 = vperm.xlu1 %188, %v97_v18  }
  0x9a   :  { %190 = vset.pattern.permute.xlu2 %v280_v1  ;;  %191 = vset.pattern.permute.xlu1 %v282_v19 }
  0x9b   :  { %118 = vperm.xlu2 %190, %v97_v18   ;;  %125 = vperm.xlu1 %191, %v97_v18  }
  0xa3   :  { %192 = vset.pattern.permute.xlu2 %v279_v0 }
  0xec   :  { %v112_v20 = vpop.permute.xlu2 %111 }
  0xed   :  { %v115_v28 = vmul.f32 %v114_v24, %v112_v20 }
  0xf5   :  { %v119_v30 = vpop.permute.xlu2 %118 }
  0xf6   :  { %v122_v33 = vmul.f32 %v121_v29, %v119_v30 }
 0x104   :  { %v102_v25 = vpop.permute.xlu1 %101 }
 0x105   :  { %v105_v26 = vmul.f32 %v104_v22, %v102_v25 }
 0x107   :  { %v109_v27 = vadd.f32 %v194_v23, %v105_v26 }
 0x109   :  { %v116_v31 = vadd.f32 %v115_v28, %v109_v27 }
 0x10b   :  { %v123_v35 = vadd.f32 %v122_v33, %v116_v31 }
 0x10d   :  { %v126_v34 = vpop.permute.xlu1 %125 }
 0x10e   :  { %v129_v36 = vmul.f32 %v128_v32, %v126_v34 }
 0x110   :  { %v130_v37 = vadd.f32 %v129_v36, %v123_v35 }
 0x112   :  { %v131_v38 = vmax.f32 %v130_v37, 0.0 }
 0x114   :  { %145 = vperm.xlu0 %186, %v131_v38   ;;  %135 = vperm.xlu2 %192, %v131_v38  }
 0x16e   :  { %v136_v41 = vpop.permute.xlu2 %135 }
 0x16f   :  { %v139_v43 = vmul.f32 %v138_v40, %v136_v41 }
 0x171   :  { %v143_v46 = vadd.f32 %v195_v42, %v139_v43 }
 0x186   :  { %v146_v45 = vpop.permute.xlu0 %145 }
 0x187   :  { %v149_v47 = vmul.f32 %v148_v44, %v146_v45 }
 0x189   :  { %v150_v48 = vadd.f32 %v149_v47, %v143_v46 }
 0x18b   :  { %v151_v49 = vsub.f32 0.0, %v150_v48 }
 0x18d   :  { %v152_v50 = vmul.f32 1.442695, %v151_v49 }
 0x18f   :  { %196 = vpow2.f32 %v152_v50 }
 0x195   :  { %v197_v51 = vpop.eup %196 }
 0x196   :  { %v154_v52 = vadd.f32 1.0, %v197_v51 }
 0x198   :  { %198 = vrcp.f32 %v154_v52  ;;  %v166_v56 = vand.u32 2147483648, %v154_v52  ;;  %v164_v58 = vand.u32 2147483647, %v154_v52  ;;  %vm160_vm1 = vweird.f32 %v154_v52 }
 0x19a   :  { %v167_v60 = vor.u32 1.1754944e-38, %v166_v56  ;;  %vm165_vm4 = vcmp.eq.f32.partialorder %v164_v58, 8.507059e+37 }
 0x19e   :  { %v199_v53 = vpop.eup %198 }
 0x19f   :  { %v156_v54 = vmul.f32 %v199_v53, %v154_v52  ;;  %vm161_vm0 = vweird.f32 %v199_v53 }
 0x1a0   :  { %vm162_vm3 = vmor %vm160_vm1, %vm161_vm0 }
 0x1a1   :  { %v157_v55 = vsub.f32 1.0, %v156_v54 }
 0x1a3   :  { %v158_v57 = vmul.f32 %v199_v53, %v157_v55 }
 0x1a5   :  { %v159_v59 = vadd.f32 %v199_v53, %v158_v57 }
 0x1a7   :  { %v163_v61 = vsel %vm162_vm3, %v199_v53, %v159_v59 }
 0x1a8   :  { %v168_v62 = vsel %vm165_vm4, %v167_v60, %v163_v61 }
 0x1a9   :  { %171 = vst.msk [vmem:[%s354_s7] sm:$0xff] %vm170_vm2, %v168_v62 }
 0x1aa   :  { %176 = vsyncpa [#allocation3], 1 }
 0x1ab   :  { %177 = vsyncpa [#allocation5], 1 }

</bundles_post_ra>
